<compile_context>
chip_gen: v6e
topology: v6e:2x2x1
jax: 0.10.0
libtpu: 0.0.40
codegen_flags: <defaults>
</compile_context>

<pallas_src>
import functools

import jax
import jax.numpy as jnp
from jax import lax
from jax.experimental import pallas as pl
from jax.experimental.pallas import tpu as pltpu


# ---------------------------------------------------------------------------
# Path A: weight shard resident in VMEM, gather as a one-hot matmul on the MXU.
# ---------------------------------------------------------------------------
def _onehot_embed_kernel(local_ref, w_ref, o_ref, *, v_chunk, precision):
    """o[t] = w[local[t]] if 0 <= local[t] < V_local else 0 (one_hot @ w)."""
    t = local_ref.shape[0]
    v_local, d = w_ref.shape
    local = local_ref[...]                                      # (T, 1) int32

    def chunk_dot(base, size):
        cols = base + lax.broadcasted_iota(jnp.int32, (t, size), 1)
        # Out-of-shard / padded ids match no column -> all-zero one-hot row.
        onehot = (local == cols).astype(w_ref.dtype)            # (T, size)
        return jnp.dot(onehot, w_ref[pl.ds(base, size), :],
                       preferred_element_type=jnp.float32,
                       precision=precision)

    # NOTE: like any one-hot-matmul gather, an Inf/NaN anywhere in the resident
    # shard would contaminate the whole block (0 * Inf = NaN); weights are
    # assumed finite (Path B has no such restriction).
    if v_local <= v_chunk:
        acc = chunk_dot(0, v_local)
    else:
        n_full = v_local // v_chunk
        rem = v_local - n_full * v_chunk

        def body(c, a):
            base = pl.multiple_of(c * v_chunk, v_chunk)
            return a + chunk_dot(base, v_chunk)

        acc = lax.fori_loop(0, n_full, body, jnp.zeros((t, d), jnp.float32))
        if rem:
            acc = acc + chunk_dot(n_full * v_chunk, rem)        # static tail chunk

    o_ref[...] = acc.astype(o_ref.dtype)


# ---------------------------------------------------------------------------
# Path B: weight in HBM, manual per-row DMA gather, NBUF-deep prefetch.
# ---------------------------------------------------------------------------
def _dma_gather_kernel(rows_smem, local_ref, w_hbm, o_ref, gbuf, sems,
                       *, v_local, block_t, nbuf, prime):
    i = pl.program_id(0)
    nblk = pl.num_programs(0)

    def issue(blk, slot):
        # rows_smem already holds clamped local row ids (precomputed in the
        # wrapper), so per-row work is one SMEM load + one descriptor push.
        base = blk * block_t

        @pl.loop(0, block_t, step=4)            # 4-way unrolled issue loop
        def _(r):
            for u in range(4):
                row = rows_smem[base + r + u]
                pltpu.make_async_copy(
                    w_hbm.at[pl.ds(row, 1)],
                    gbuf.at[slot, pl.ds(r + u, 1)],
                    sems.at[slot],
                ).start()

    # Prime: first grid step launches the first `prime` (= min(nbuf-1, nblk)) blocks.
    @pl.when(i == 0)
    def _():
        for b in range(prime):                   # static python loop, nbuf is tiny
            issue(b, b)

    # Steady state: keep nbuf-1 blocks of row fetches in flight ahead of compute.
    nxt = i + (nbuf - 1)

    @pl.when(nxt < nblk)
    def _():
        issue(nxt, nxt % nbuf)

    # Drain block i with a SINGLE wait: DMA semaphores count bytes, and one
    # descriptor covering the whole (block_t, D) slot equals the sum of the
    # block_t per-row copies (padded / out-of-shard tokens still fetch row 0,
    # so byte accounting always matches).
    slot = i % nbuf
    pltpu.make_async_copy(gbuf.at[slot], gbuf.at[slot], sems.at[slot]).wait()

    # Vectorized in-shard mask over the whole (T, D) tile, single lane-dense store.
    local = local_ref[...]                                      # (T, 1) int32
    in_range = jnp.logical_and(local >= 0, local < v_local)     # (T, 1)
    rows = gbuf[slot]                                           # (T, D)
    o_ref[...] = jnp.where(in_range, rows, jnp.zeros_like(rows)).astype(o_ref.dtype)


# ---------------------------------------------------------------------------
# Wrapper / path selection
# ---------------------------------------------------------------------------
_RESIDENT_MAX_BYTES = 16 * 1024 * 1024     # resident shard cap (single VMEM copy)
_PATH_A_PIPE_BUDGET = 8 * 1024 * 1024      # Path A per-block pipeline buffers
_PATH_B_PIPE_BUDGET = 20 * 1024 * 1024     # Path B buffers (fits v7x 64 MiB VMEM)
_V_CHUNK = 512                             # Path A one-hot contraction K tile
_NBUF = 3                                  # Path B gather depth (prefetch 2 ahead)

# Crude, generation-conservative cost model (v5e-safe MXU rate, per-row DMA
# descriptor overhead) used to pick between the one-hot-MXU and row-DMA paths.
_MXU_FLOPS = 5.0e13
_HBM_BW = 8.0e11
_ROW_DMA_OVERHEAD_S = 5.0e-8


def _round_up(x, m):
    return ((x + m - 1) // m) * m


def _round_down(x, m):
    return (x // m) * m


def vocab_parallel_embedding(x, weight, vocab_start_idx=0, block_tokens=256,
                             force_gather=False):
    """y[..., :] = weight[x - vocab_start_idx], zero for ids outside the shard."""
    v_local, d = weight.shape
    dtype_bytes = jnp.dtype(weight.dtype).itemsize
    row_bytes = d * dtype_bytes
    w_bytes = v_local * row_bytes

    ids = x.reshape(-1).astype(jnp.int32)
    n = ids.shape[0]

    # --- path selection (byte cap + per-token cost model) --------------------
    onehot_cost = 2.0 * v_local * d / _MXU_FLOPS                 # per token
    gather_cost = row_bytes / _HBM_BW + _ROW_DMA_OVERHEAD_S      # per token
    resident = ((not force_gather)
                and w_bytes <= _RESIDENT_MAX_BYTES
                and onehot_cost <= gather_cost)

    # --- token block: amortize grid overhead, stay inside the VMEM budget ----
    sub = {4: 8, 2: 16, 1: 32}.get(dtype_bytes, 8)               # sublane pack
    if resident:
        per_tok = 2 * row_bytes + 4 * d + 2 * min(v_local, _V_CHUNK) * 4 + 8
        budget = _PATH_A_PIPE_BUDGET
    else:
        per_tok = (_NBUF + 2) * row_bytes + 8
        budget = _PATH_B_PIPE_BUDGET
    max_t = max(sub, _round_down(budget // per_tok, sub))
    block_t = max(sub, min(_round_up(block_tokens, sub), max_t, _round_up(n, sub)))

    n_pad = _round_up(n, block_t)
    local = ids - vocab_start_idx
    if n_pad != n:
        local = jnp.pad(local, (0, n_pad - n))                   # pad rows sliced off
    local_col = local.reshape(n_pad, 1)
    n_blocks = n_pad // block_t

    if resident:
        precision = (lax.Precision.HIGHEST
                     if weight.dtype == jnp.float32 else None)   # exact f32 gather
        vmem_limit = min(56 << 20, max(
            32 << 20, 2 * w_bytes + 2 * block_t * row_bytes + (8 << 20)))
        out = pl.pallas_call(
            functools.partial(_onehot_embed_kernel,
                              v_chunk=_V_CHUNK, precision=precision),
            out_shape=jax.ShapeDtypeStruct((n_pad, d), weight.dtype),
            grid=(n_blocks,),
            in_specs=[
                pl.BlockSpec((block_t, 1), lambda i: (i, 0)),    # local token ids
                # Whole shard resident in VMEM: loaded once, no double buffering.
                pl.BlockSpec(memory_space=pltpu.MemorySpace.VMEM),
            ],
            out_specs=pl.BlockSpec((block_t, d), lambda i: (i, 0)),
            compiler_params=pltpu.CompilerParams(
                dimension_semantics=("parallel",),               # 2 TCs on v7x
                vmem_limit_bytes=vmem_limit,
            ),
        )(local_col, weight)
    else:
        rows = jnp.clip(local, 0, v_local - 1)                   # clamped row ids
        vmem_limit = min(56 << 20, max(
            32 << 20, (_NBUF + 2) * block_t * row_bytes + (8 << 20)))
        kernel = functools.partial(
            _dma_gather_kernel, v_local=v_local, block_t=block_t,
            nbuf=_NBUF, prime=min(_NBUF - 1, n_blocks))
        # TODO(synk): on v7x, split the block axis across the 2 TensorCores
        # (outer "parallel" axis + per-core priming); kept sequential here so the
        # cross-step prefetch / slot carry stays simple and provably correct.
        out = pl.pallas_call(
            kernel,
            out_shape=jax.ShapeDtypeStruct((n_pad, d), weight.dtype),
            grid_spec=pltpu.PrefetchScalarGridSpec(
                num_scalar_prefetch=1,                           # row ids -> SMEM
                grid=(n_blocks,),
                in_specs=[
                    pl.BlockSpec((block_t, 1), lambda i, rows_smem: (i, 0)),
                    pl.BlockSpec(memory_space=pl.ANY),           # weight stays in HBM
                ],
                out_specs=pl.BlockSpec((block_t, d), lambda i, rows_smem: (i, 0)),
                scratch_shapes=[
                    pltpu.VMEM((_NBUF, block_t, d), weight.dtype),  # gather buffers
                    pltpu.SemaphoreType.DMA((_NBUF,)),
                ],
            ),
            compiler_params=pltpu.CompilerParams(
                dimension_semantics=("arbitrary",),              # cross-step prefetch
                vmem_limit_bytes=vmem_limit,
            ),
        )(rows, local_col, weight)

    # TODO(synk): tp_size > 1 would all_reduce `out` across the TP group here
    # (jax.lax.psum under shard_map); single device in this script.
    return out[:n].reshape(x.shape + (d,))


if __name__ == "__main__":
    # Small shapes consistent with the module: vocab=256, dim=128, batch=2, seq=8.
    num_embeddings = 256
    embedding_dim = 128
    batch, seq = 2, 8

    key = jax.random.PRNGKey(0)
    k_w, k_x = jax.random.split(key)
    weight = jax.random.normal(k_w, (num_embeddings, embedding_dim), jnp.float32)
    x = jax.random.randint(k_x, (batch, seq), 0, num_embeddings, jnp.int32)

    # 1) tp_size == 1 path: plain gather (resident one-hot path).
    y = jax.block_until_ready(vocab_parallel_embedding(x, weight))
    y_ref = jnp.take(weight, x.reshape(-1), axis=0).reshape(batch, seq, embedding_dim)
    assert y.shape == (batch, seq, embedding_dim)
    assert y.dtype == weight.dtype
    assert jnp.allclose(y, y_ref), "mismatch vs reference embedding (resident path)"

    # 2) Multi-block + padding path (n not a multiple of the token block).
    x2 = jax.random.randint(jax.random.PRNGKey(1), (3, 37), 0, num_embeddings, jnp.int32)
    y2 = jax.block_until_ready(vocab_parallel_embedding(x2, weight, block_tokens=64))
    y2_ref = jnp.take(weight, x2.reshape(-1), axis=0).reshape(3, 37, embedding_dim)
    assert jnp.allclose(y2, y2_ref), "mismatch on multi-block resident path"

    # 3) TP-shard semantics: shard owns rows [64, 192); out-of-shard ids -> zero rows.
    shard_start, shard_rows = 64, 128
    w_shard = weight[shard_start:shard_start + shard_rows]
    y3 = jax.block_until_ready(
        vocab_parallel_embedding(x, w_shard, vocab_start_idx=shard_start))
    in_shard = (x >= shard_start) & (x < shard_start + shard_rows)
    y3_ref = jnp.where(in_shard[..., None], y_ref, 0.0)
    assert jnp.allclose(y3, y3_ref), "mismatch vs shard-masked reference (resident)"

    # 4) HBM row-DMA gather path (multi-block: deep prefetch + single drain).
    y4 = jax.block_until_ready(
        vocab_parallel_embedding(x2, weight, block_tokens=16, force_gather=True))
    assert jnp.allclose(y4, y2_ref), "mismatch on DMA-gather path"

    # 5) DMA-gather path with TP-shard masking.
    y5 = jax.block_until_ready(
        vocab_parallel_embedding(x, w_shard, vocab_start_idx=shard_start,
                                 block_tokens=8, force_gather=True))
    assert jnp.allclose(y5, y3_ref), "mismatch on shard-masked DMA-gather path"

    # 6) Larger vocab on the resident path: exercises the chunked one-hot
    #    contraction (2 full K tiles of 512 + a 128-row remainder tile).
    v_big = 1152
    w_big = jax.random.normal(jax.random.PRNGKey(2), (v_big, embedding_dim), jnp.float32)
    x3 = jax.random.randint(jax.random.PRNGKey(3), (4, 96), 0, v_big, jnp.int32)
    y6 = jax.block_until_ready(vocab_parallel_embedding(x3, w_big))
    y6_ref = jnp.take(w_big, x3.reshape(-1), axis=0).reshape(4, 96, embedding_dim)
    assert jnp.allclose(y6, y6_ref), "mismatch on chunked one-hot path"

    print("KERNEL_OK")
</pallas_src>

<mosaic_0001>
module attributes {stable_mosaic.version = 11 : i64} {
  func.func @_onehot_embed_kernel(%arg0: i32, %arg1: memref<16x1xi32, #tpu.memory_space<vmem>>, %arg2: memref<256x128xf32, #tpu.memory_space<vmem>>, %arg3: memref<16x128xf32, #tpu.memory_space<vmem>>) attributes {dimension_semantics = [#tpu.dimension_semantics<parallel>], iteration_bounds = array<i64: 1>, scalar_prefetch = 0 : i64, scratch_operands = 0 : i64, tpu.core_type = #tpu.core_type<tc>, window_params = [{transform_indices = @transform_0, window_bounds = array<i64: 16, 1>}, {pipeline_mode = #tpu.pipeline_mode<synchronous>, transform_indices = @transform_1, window_bounds = array<i64: 256, 128>}, {transform_indices = @transform_2, window_bounds = array<i64: 16, 128>}]} {
    %c0 = arith.constant 0 : index
    %c0_0 = arith.constant 0 : index
    %0 = vector.load %arg1[%c0, %c0_0] : memref<16x1xi32, #tpu.memory_space<vmem>>, vector<16x1xi32>
    %1 = tpu.iota {dimensions = array<i32: 1>} : vector<16x256xi32>
    %c0_i32 = arith.constant 0 : i32
    %2 = vector.broadcast %c0_i32 : i32 to vector<16x256xi32>
    %3 = arith.addi %2, %1 : vector<16x256xi32>
    %4 = vector.broadcast %0 : vector<16x1xi32> to vector<16x256xi32>
    %5 = arith.cmpi eq, %4, %3 : vector<16x256xi32>
    %6 = arith.extui %5 : vector<16x256xi1> to vector<16x256xi32>
    %7 = arith.sitofp %6 : vector<16x256xi32> to vector<16x256xf32>
    %c0_1 = arith.constant 0 : index
    %c0_2 = arith.constant 0 : index
    %8 = vector.load %arg2[%c0_1, %c0_2] : memref<256x128xf32, #tpu.memory_space<vmem>>, vector<256x128xf32>
    %cst = arith.constant dense<0.000000e+00> : vector<16x128xf32>
    %9 = tpu.matmul %7, %8, %cst {dimension_numbers = #tpu.dot_dimension_numbers<[1], [0], [0], [1], [0, 0, 1, 1], [], []>, precision = #tpu.contract_precision<fp32>} : vector<16x256xf32>, vector<256x128xf32>, vector<16x128xf32> -> vector<16x128xf32>
    %c0_3 = arith.constant 0 : index
    %c0_4 = arith.constant 0 : index
    %10 = vector.load %arg3[%c0_3, %c0_4] : memref<16x128xf32, #tpu.memory_space<vmem>>, vector<16x128xf32>
    tpu.vector_store %arg3[%c0_3, %c0_4], %9 {strides = array<i32>} : memref<16x128xf32, #tpu.memory_space<vmem>>, vector<16x128xf32>,
    return
  }
  func.func @transform_0(%arg0: i32) -> (i32, i32) {
    %c0_i32 = arith.constant 0 : i32
    %c0_i32_0 = arith.constant 0 : i32
    return %arg0, %c0_i32 : i32, i32
  }
  func.func @transform_1(%arg0: i32) -> (i32, i32) {
    %c0_i32 = arith.constant 0 : i32
    %c0_i32_0 = arith.constant 0 : i32
    %c0_i32_1 = arith.constant 0 : i32
    return %c0_i32, %c0_i32_0 : i32, i32
  }
  func.func @transform_2(%arg0: i32) -> (i32, i32) {
    %c0_i32 = arith.constant 0 : i32
    %c0_i32_0 = arith.constant 0 : i32
    return %arg0, %c0_i32 : i32, i32
  }
}

</mosaic_0001>

<bundles_post_ra>
// kernel: tpu_custom_call.1
= control target key start
LH: loop header
LB: loop body
LE: loop exit
PB: predicated region body
PF: predicated region fallthrough
CT: control target
= control target key end

     0   :  { %7 = vsyncpa [#allocation3], 0  ;;  %s1934_s0 = inlined_call_operand.vmem [shape: s32[16,1], index: 0, kind: input, shape index: {}]   ;;  %s1935_s1 = inlined_call_operand.hbm [shape: f32[256,128], index: 1, kind: input, shape index: {}]   ;;  %s1936_s2 = inlined_call_operand.hbm [shape: f32[16,128], index: 2, kind: output, shape index: {}]  }
   0x1   :  { %8 = vsyncpa [#allocation4], 0  ;;  %s1314_s9 = smov [#allocation2]  }
   0x2   :  { %s16_s10 = sshll.u32 %s1314_s9, 4  ;;  %s17_s10 = int_to_ptr.vmem [resolvable:$true] %s16_s10 }
   0x3   :  { %s1278_s11 = scalar_lea.vmem %s17_s10, 4096  ;;  %p1283_p1 = scmp.lt.s32.totalorder %s17_s10, %s17_s10 }
   0x4   :  { %p1279_p0 = scmp.ne.s32.totalorder %s17_s10, %s1278_s11  ;;  %p1284_p2 = scmp.lt.s32.totalorder %s1278_s11, %s1278_s11 }
   0x6   :  { %p1285_p3 = por %p1284_p2, %p1283_p1 }
   0x8   :  { %p1286_p4 = pnand %p1285_p3, %p1279_p0 }
   0xa   :  { %1289 = shalt.err (!%p1286_p4)
}
   0xb   :  { %s1315_s12 = smov 128   ;;  %s1316_s13 = smov 8  }
   0xc   :  { %22 = dma.hbm_to_vmem [thread:$0]  %s1935_s1, 4096, %s17_s10, [#allocation3], %s1315_s12, %s1315_s12, %s1316_s13  }
   0xd   :  { %1310 = dma.done.wait [#allocation3], 4096  }
   0xe   :  { %1311 = vsyncadd [#allocation3], 4294963200  ;;  %v1317_v0 = vmov 0   ;;  %v26_v1 = vld [vmem:[%s1934_s0] sm:$0xff]  ;;  %v27_v2 = vld [vmem:[%s1934_s0 + $0x8] sm:$0xff]  ;;  %s1320_s0 = smov [#allocation5]  }
   0xf   :  { %1269 = vset.pattern.permute.xlu0 %v1317_v0  ;;  %v80_v3 = vld [vmem:[#allocation2 + $0xf8] sm:$0xff]  ;;  %v79_v6 = vld [vmem:[#allocation2 + $0xf0] sm:$0xff]  ;;  %v78_v11 = vld [vmem:[#allocation2 + $0xe8] sm:$0xff]  ;;  %s1006_s1 = sshll.u32 %s1320_s0, 4  ;;  %s1007_s1 = int_to_ptr.vmem [resolvable:$true] %s1006_s1 }
  0x10   :  { %32 = vperm.xlu0 %1269, %v26_v1   ;;  %v1348_v4 = vand.u32 4294901760, %v80_v3  ;;  %v64_v5 = vld [vmem:[#allocation2 + $0x78] sm:$0xff]  ;;  %v63_v7 = vld [vmem:[#allocation2 + $0x70] sm:$0xff]  ;;  %v1352_v9 = vand.u32 4294901760, %v79_v6  ;;  %v62_v12 = vld [vmem:[#allocation2 + $0x68] sm:$0xff]  ;;  %v1359_v15 = vand.u32 4294901760, %v78_v11  ;;  %p1295_p6 = scmp.lt.s32.totalorder %s1007_s1, %s1007_s1 }
  0x11   :  { %v1350_v8 = vand.u32 4294901760, %v64_v5  ;;  %v1354_v10 = vand.u32 4294901760, %v63_v7  ;;  %v77_v13 = vld [vmem:[#allocation2 + $0xe0] sm:$0xff]  ;;  %v1361_v16 = vand.u32 4294901760, %v62_v12  ;;  %v76_v39 = vld [vmem:[#allocation2 + $0xd8] sm:$0xff]  ;;  %v75_v45 = vld [vmem:[#allocation2 + $0xd0] sm:$0xff] }
  0x12   :  { %v1357_v14 = vsub.f32 %v80_v3, %v1348_v4  ;;  %v1363_v17 = vand.u32 4294901760, %v77_v13  ;;  %v61_v18 = vld [vmem:[#allocation2 + $0x60] sm:$0xff]  ;;  %1034 = vmatprep.subr.mxu0 %v1348_v4  ;;  %v1370_v20 = vsub.f32 %v79_v6, %v1352_v9  ;;  %v1380_v24 = vsub.f32 %v78_v11, %v1359_v15  ;;  %v60_v44 = vld [vmem:[#allocation2 + $0x58] sm:$0xff]  ;;  %v59_v46 = vld [vmem:[#allocation2 + $0x50] sm:$0xff]  ;;  %s1290_s20 = scalar_lea.vmem %s1007_s1, 256 }
  0x13   :  { %v1367_v19 = vsub.f32 %v64_v5, %v1350_v8  ;;  %v1373_v21 = vsub.f32 %v63_v7, %v1354_v10  ;;  %v1375_v22 = vand.u32 4294901760, %v61_v18  ;;  %1035 = vmatpush3.msra.mxu0 %v1350_v8  ;;  %v1383_v25 = vsub.f32 %v62_v12, %v1361_v16  ;;  %v74_v51 = vld [vmem:[#allocation2 + $0xc8] sm:$0xff]  ;;  %v73_v53 = vld [vmem:[#allocation2 + $0xc0] sm:$0xff]  ;;  %p1291_p5 = scmp.ne.s32.totalorder %s1007_s1, %s1290_s20  ;;  %p1296_p7 = scmp.lt.s32.totalorder %s1290_s20, %s1290_s20 }
  0x14   :  { %2006 = vst [vmem:[#allocation8_spill] sm:$0xff] %v1357_v14  ;;  %35 = vperm.xlu0 %1269, %v27_v2   ;;  %v1956_v23 = vand.u32 4294901760, %v1357_v14  ;;  %v1386_v26 = vsub.f32 %v77_v13, %v1363_v17  ;;  %1036 = vmatprep.subr.mxu0 %v1352_v9  ;;  %v1951_v28 = vand.u32 4294901760, %v1370_v20  ;;  %v1949_v32 = vand.u32 4294901760, %v1380_v24  ;;  %v58_v52 = vld [vmem:[#allocation2 + $0x48] sm:$0xff]  ;;  %v57_v58 = vld [vmem:[#allocation2 + $0x40] sm:$0xff] }
  0x15   :  { %v1954_v27 = vand.u32 4294901760, %v1367_v19  ;;  %v1950_v29 = vand.u32 4294901760, %v1373_v21  ;;  %v1393_v30 = vsub.f32 %v61_v18, %v1375_v22  ;;  %1037 = vmatpush3.msra.mxu0 %v1354_v10  ;;  %v1947_v33 = vand.u32 4294901760, %v1383_v25  ;;  %p1297_p8 = por %p1296_p7, %p1295_p6 }
  0x16   :  { %v324_v31 = vsub.f32 %v1357_v14, %v1956_v23  ;;  %v1946_v34 = vand.u32 4294901760, %v1386_v26  ;;  %1038 = vmatprep.subr.mxu0 %v1359_v15  ;;  %v331_v36 = vsub.f32 %v1370_v20, %v1951_v28  ;;  %v338_v41 = vsub.f32 %v1380_v24, %v1949_v32  ;;  %v51_v23 = vld [vmem:[#allocation2 + $0x10] sm:$0xff] }
  0x17   :  { %v212_v35 = vsub.f32 %v1367_v19, %v1954_v27  ;;  %v219_v37 = vsub.f32 %v1373_v21, %v1950_v29  ;;  %v1944_v38 = vand.u32 4294901760, %v1393_v30  ;;  %1039 = vmatpush3.msra.mxu0 %v1361_v16  ;;  %v226_v42 = vsub.f32 %v1383_v25, %v1947_v33  ;;  %v68_v29 = vld [vmem:[#allocation2 + $0x98] sm:$0xff]  ;;  %p1298_p9 = pnand %p1297_p8, %p1291_p5 }
  0x18   :  { %v325_v40 = vand.u32 4294901760, %v324_v31  ;;  %v345_v43 = vsub.f32 %v1386_v26, %v1946_v34  ;;  %1040 = vmatprep.subr.mxu0 %v1363_v17  ;;  %v332_v48 = vand.u32 4294901760, %v331_v36  ;;  %v339_v54 = vand.u32 4294901760, %v338_v41  ;;  %v52_v27 = vld [vmem:[#allocation2 + $0x18] sm:$0xff] }
  0x19   :  { %v213_v47 = vand.u32 4294901760, %v212_v35  ;;  %v220_v49 = vand.u32 4294901760, %v219_v37  ;;  %v233_v50 = vsub.f32 %v1393_v30, %v1944_v38  ;;  %1041 = vmatpush3.msra.mxu0 %v1375_v22  ;;  %v227_v55 = vand.u32 4294901760, %v226_v42 }
  0x1a   :  { %1072 = vmatprep.subr.mxu1 %v325_v40  ;;  %v346_v56 = vand.u32 4294901760, %v345_v43  ;;  %v1428_v57 = vand.u32 4294901760, %v76_v39  ;;  %v1430_v60 = vand.u32 4294901760, %v60_v44  ;;  %v1432_v61 = vand.u32 4294901760, %v75_v45 }
  0x1b   :  { %1073 = vmatpush3.msra.mxu1 %v213_v47  ;;  %v234_v59 = vand.u32 4294901760, %v233_v50  ;;  %v1434_v62 = vand.u32 4294901760, %v59_v46  ;;  %v1439_v0 = vand.u32 4294901760, %v74_v51  ;;  %v1441_v1 = vand.u32 4294901760, %v58_v52  ;;  %v72_v47 = vld [vmem:[#allocation2 + $0xb8] sm:$0xff] }
  0x1c   :  { %1074 = vmatprep.subr.mxu1 %v332_v48  ;;  %v1437_v63 = vsub.f32 %v76_v39, %v1428_v57  ;;  %v1443_v2 = vand.u32 4294901760, %v73_v53  ;;  %1042 = vmatprep.subr.mxu0 %v1428_v57  ;;  %v1447_v3 = vsub.f32 %v60_v44, %v1430_v60  ;;  %v1450_v5 = vsub.f32 %v75_v45, %v1432_v61 }
  0x1d   :  { %1075 = vmatpush3.msra.mxu1 %v220_v49  ;;  %v1453_v6 = vsub.f32 %v59_v46, %v1434_v62  ;;  %v1455_v7 = vand.u32 4294901760, %v57_v58  ;;  %1043 = vmatpush3.msra.mxu0 %v1430_v60  ;;  %v1460_v12 = vsub.f32 %v74_v51, %v1439_v0  ;;  %v1463_v13 = vsub.f32 %v58_v52, %v1441_v1  ;;  %v56_v52 = vld [vmem:[#allocation2 + $0x38] sm:$0xff] }
  0x1e   :  { %1076 = vmatprep.subr.mxu1 %v339_v54  ;;  %v1943_v11 = vand.u32 4294901760, %v1437_v63  ;;  %v1466_v18 = vsub.f32 %v73_v53, %v1443_v2  ;;  %1044 = vmatprep.subr.mxu0 %v1432_v61  ;;  %v1942_v31 = vand.u32 4294901760, %v1447_v3  ;;  %v1941_v35 = vand.u32 4294901760, %v1450_v5  ;;  %v71_v53 = vld [vmem:[#allocation2 + $0xb0] sm:$0xff] }
  0x1f   :  { %1077 = vmatpush3.msra.mxu1 %v227_v55  ;;  %v1938_v36 = vand.u32 4294901760, %v1453_v6  ;;  %v1473_v37 = vsub.f32 %v57_v58, %v1455_v7  ;;  %1045 = vmatpush3.msra.mxu0 %v1434_v62  ;;  %v1937_v40 = vand.u32 4294901760, %v1460_v12  ;;  %v1939_v41 = vand.u32 4294901760, %v1463_v13  ;;  %v55_v54 = vld [vmem:[#allocation2 + $0x30] sm:$0xff] }
  0x20   :  { %2007 = vst [vmem:[#allocation9_spill] sm:$0xff] %v1466_v18  ;;  %1078 = vmatprep.subr.mxu1 %v346_v56  ;;  %v352_v39 = vsub.f32 %v1437_v63, %v1943_v11  ;;  %v1940_v42 = vand.u32 4294901760, %v1466_v18  ;;  %1046 = vmatprep.subr.mxu0 %v1439_v0  ;;  %v240_v43 = vsub.f32 %v1447_v3, %v1942_v31  ;;  %v1508_v31 = vand.u32 4294901760, %v72_v47  ;;  %v53_v11 = vld [vmem:[#allocation2 + $0x20] sm:$0xff] }
  0x21   :  { %2008 = vst [vmem:[#allocation10_spill] sm:$0xff] %v1473_v37  ;;  %1079 = vmatpush3.msra.mxu1 %v234_v59  ;;  %v359_v44 = vsub.f32 %v1450_v5, %v1941_v35  ;;  %v247_v45 = vsub.f32 %v1453_v6, %v1938_v36  ;;  %v1945_v46 = vand.u32 4294901760, %v1473_v37  ;;  %1047 = vmatpush3.msra.mxu0 %v1441_v1  ;;  %v69_v36 = vld [vmem:[#allocation2 + $0xa0] sm:$0xff]  ;;  %v1514_v38 = vand.u32 4294901760, %v55_v54 }
  0x22   :  { %v353_v48 = vand.u32 4294901760, %v352_v39  ;;  %v366_v49 = vsub.f32 %v1460_v12, %v1937_v40  ;;  %v254_v50 = vsub.f32 %v1463_v13, %v1939_v41  ;;  %v373_v51 = vsub.f32 %v1466_v18, %v1940_v42  ;;  %1048 = vmatprep.subr.mxu0 %v1443_v2  ;;  %v70_v39 = vld [vmem:[#allocation2 + $0xa8] sm:$0xff] }
  0x23   :  { %v241_v55 = vand.u32 4294901760, %v240_v43  ;;  %v360_v56 = vand.u32 4294901760, %v359_v44  ;;  %v248_v58 = vand.u32 4294901760, %v247_v45  ;;  %v261_v59 = vsub.f32 %v1473_v37, %v1945_v46  ;;  %v54_v40 = vld [vmem:[#allocation2 + $0x28] sm:$0xff]  ;;  %1049 = vmatpush3.msra.mxu0 %v1455_v7  ;;  %v49_v37 = vld [vmem:[#allocation2] sm:$0xff] }
  0x24   :  { %1080 = vmatprep.subr.mxu1 %v353_v48  ;;  %v367_v41 = vand.u32 4294901760, %v366_v49  ;;  %v255_v42 = vand.u32 4294901760, %v254_v50  ;;  %v374_v35 = vand.u32 4294901760, %v373_v51  ;;  %v1510_v44 = vand.u32 4294901760, %v56_v52  ;;  %1050 = vmatprep.subr.mxu0 %v1508_v31 }
  0x25   :  { %1081 = vmatpush3.msra.mxu1 %v241_v55  ;;  %v262_v43 = vand.u32 4294901760, %v261_v59  ;;  %v1512_v45 = vand.u32 4294901760, %v71_v53  ;;  %v1517_v46 = vsub.f32 %v72_v47, %v1508_v31  ;;  %v1519_v34 = vand.u32 4294901760, %v70_v39 }
  0x26   :  { %1082 = vmatprep.subr.mxu1 %v360_v56  ;;  %v1521_v48 = vand.u32 4294901760, %v54_v40  ;;  %v1523_v49 = vand.u32 4294901760, %v69_v36  ;;  %v1527_v50 = vsub.f32 %v56_v52, %v1510_v44  ;;  %v1533_v55 = vsub.f32 %v55_v54, %v1514_v38  ;;  %1051 = vmatpush3.msra.mxu0 %v1510_v44 }
  0x27   :  { %2009 = vst [vmem:[#allocation11_spill] sm:$0xff] %v1517_v46  ;;  %1083 = vmatpush3.msra.mxu1 %v248_v58  ;;  %v1530_v51 = vsub.f32 %v71_v53, %v1512_v45  ;;  %v1535_v47 = vand.u32 4294901760, %v53_v11  ;;  %v1948_v56 = vand.u32 4294901760, %v1517_v46  ;;  %v1540_v59 = vsub.f32 %v70_v39, %v1519_v34  ;;  %1052 = vmatprep.subr.mxu0 %v1512_v45 }
  0x28   :  { %2010 = vst [vmem:[#allocation12_spill] sm:$0xff] %v1527_v50  ;;  %2012 = vst [vmem:[#allocation14_spill] sm:$0xff] %v1533_v55  ;;  %1084 = vmatprep.subr.mxu1 %v367_v41  ;;  %v1543_v58 = vsub.f32 %v54_v40, %v1521_v48  ;;  %v1546_v52 = vsub.f32 %v69_v36, %v1523_v49  ;;  %v1952_v53 = vand.u32 4294901760, %v1527_v50  ;;  %v1955_v41 = vand.u32 4294901760, %v1533_v55 }
  0x29   :  { %2011 = vst [vmem:[#allocation13_spill] sm:$0xff] %v1530_v51  ;;  %2013 = vst [vmem:[#allocation15_spill] sm:$0xff] %v1540_v59  ;;  %1085 = vmatpush3.msra.mxu1 %v255_v42  ;;  %v1953_v54 = vand.u32 4294901760, %v1530_v51  ;;  %v1553_v33 = vsub.f32 %v53_v11, %v1535_v47  ;;  %1053 = vmatpush3.msra.mxu0 %v1514_v38  ;;  %v380_v36 = vsub.f32 %v1517_v46, %v1948_v56  ;;  %v65_v46 = vld [vmem:[#allocation2 + $0x80] sm:$0xff] }
  0x2a   :  { %2014 = vst [vmem:[#allocation16_spill] sm:$0xff] %v1543_v58  ;;  %2015 = vst [vmem:[#allocation17_spill] sm:$0xff] %v1546_v52  ;;  %1086 = vmatprep.subr.mxu1 %v374_v35  ;;  %v1961_v40 = vand.u32 4294901760, %v1540_v59  ;;  %v1968_v42 = vand.u32 4294901760, %v1543_v58  ;;  %v1969_v39 = vand.u32 4294901760, %v1546_v52  ;;  %1054 = vmatprep.subr.mxu0 %v1519_v34  ;;  %v268_v11 = vsub.f32 %v1527_v50, %v1952_v53  ;;  %v50_v50 = vld [vmem:[#allocation2 + $0x8] sm:$0xff] }
  0x2b   :  { %2016 = vst [vmem:[#allocation18_spill] sm:$0xff] %v1553_v33  ;;  %1087 = vmatpush3.msra.mxu1 %v262_v43  ;;  %v387_v35 = vsub.f32 %v1530_v51, %v1953_v54  ;;  %v275_v56 = vsub.f32 %v1533_v55, %v1955_v41  ;;  %1055 = vmatpush3.msra.mxu0 %v1521_v48  ;;  %v381_v28 = vand.u32 4294901760, %v380_v36  ;;  %v67_v41 = vld [vmem:[#allocation2 + $0x90] sm:$0xff]  ;;  %v2017_v51 = vand.u32 4294901760, %v1553_v33 }
  0x2c   :  { %v394_v43 = vsub.f32 %v1540_v59, %v1961_v40  ;;  %v282_v53 = vsub.f32 %v1543_v58, %v1968_v42  ;;  %v401_v54 = vsub.f32 %v1546_v52, %v1969_v39  ;;  %1056 = vmatprep.subr.mxu0 %v1523_v49  ;;  %v269_v32 = vand.u32 4294901760, %v268_v11  ;;  %v66_v59 = vld [vmem:[#allocation2 + $0x88] sm:$0xff] }
  0x2d   :  { %v388_v55 = vand.u32 4294901760, %v387_v35  ;;  %v276_v36 = vand.u32 4294901760, %v275_v56  ;;  %v289_v40 = vsub.f32 %v1553_v33, %v2017_v51  ;;  %1057 = vmatpush3.msra.mxu0 %v1535_v47  ;;  %1088 = vmatprep.subr.mxu1 %v381_v28  ;;  %v1588_v58 = vand.u32 4294901760, %v68_v29 }
  0x2e   :  { %v395_v42 = vand.u32 4294901760, %v394_v43  ;;  %v283_v39 = vand.u32 4294901760, %v282_v53  ;;  %v402_v52 = vand.u32 4294901760, %v401_v54  ;;  %1089 = vmatpush3.msra.mxu1 %v269_v32  ;;  %v1590_v35 = vand.u32 4294901760, %v52_v27 }
  0x2f   :  { %v290_v11 = vand.u32 4294901760, %v289_v40  ;;  %v1592_v56 = vand.u32 4294901760, %v67_v41  ;;  %v1594_v18 = vand.u32 4294901760, %v51_v23  ;;  %1090 = vmatprep.subr.mxu1 %v388_v55  ;;  %v1597_v51 = vsub.f32 %v68_v29, %v1588_v58  ;;  %1058 = vmatprep.subr.mxu0 %v1588_v58 }
  0x30   :  { %v1599_v33 = vand.u32 4294901760, %v66_v59  ;;  %v1601_v28 = vand.u32 4294901760, %v50_v50  ;;  %v1603_v53 = vand.u32 4294901760, %v65_v46  ;;  %1091 = vmatpush3.msra.mxu1 %v276_v36  ;;  %v1607_v32 = vsub.f32 %v52_v27, %v1590_v35  ;;  %1059 = vmatpush3.msra.mxu0 %v1590_v35 }
  0x31   :  { %2018 = vst [vmem:[#allocation19_spill] sm:$0xff] %v1594_v18  ;;  %2019 = vst [vmem:[#allocation20_spill] sm:$0xff] %v1597_v51  ;;  %v1610_v54 = vsub.f32 %v67_v41, %v1592_v56  ;;  %v1613_v55 = vsub.f32 %v51_v23, %v1594_v18  ;;  %v1615_v29 = vand.u32 4294901760, %v49_v37  ;;  %1092 = vmatprep.subr.mxu1 %v395_v42  ;;  %1060 = vmatprep.subr.mxu0 %v1592_v56 }
  0x32   :  { %2020 = vst [vmem:[#allocation21_spill] sm:$0xff] %v1599_v33  ;;  %2021 = vst [vmem:[#allocation22_spill] sm:$0xff] %v1601_v28  ;;  %v1620_v43 = vsub.f32 %v66_v59, %v1599_v33  ;;  %v1623_v36 = vsub.f32 %v50_v50, %v1601_v28  ;;  %v1626_v27 = vsub.f32 %v65_v46, %v1603_v53  ;;  %1093 = vmatpush3.msra.mxu1 %v283_v39 }
  0x33   :  { %2022 = vst [vmem:[#allocation23_spill] sm:$0xff] %v1603_v53  ;;  %2023 = vst [vmem:[#allocation24_spill] sm:$0xff] %v1607_v32  ;;  %v1986_v41 = vand.u32 4294901760, %v1610_v54  ;;  %v1633_v40 = vsub.f32 %v49_v37, %v1615_v29  ;;  %1061 = vmatpush3.msra.mxu0 %v1594_v18  ;;  %1094 = vmatprep.subr.mxu1 %v402_v52  ;;  %v2028_v50 = vand.u32 4294901760, %v1597_v51  ;;  %v2029_v42 = vand.u32 4294901760, %v1607_v32 }
  0x34   :  { %2024 = vst [vmem:[#allocation25_spill] sm:$0xff] %v1610_v54  ;;  %2025 = vst [vmem:[#allocation26_spill] sm:$0xff] %v1613_v55  ;;  %1062 = vmatprep.subr.mxu0 %v1599_v33  ;;  %1095 = vmatpush3.msra.mxu1 %v290_v11  ;;  %v2030_v18 = vand.u32 4294901760, %v1613_v55  ;;  %v2031_v39 = vand.u32 4294901760, %v1620_v43 }
  0x35   :  { %2026 = vst [vmem:[#allocation27_spill] sm:$0xff] %v1615_v29  ;;  %2027 = vst [vmem:[#allocation28_spill] sm:$0xff] %v1623_v36  ;;  %v408_v46 = vsub.f32 %v1597_v51, %v2028_v50  ;;  %v296_v37 = vsub.f32 %v1607_v32, %v2029_v42  ;;  %v415_v52 = vsub.f32 %v1610_v54, %v1986_v41  ;;  %1063 = vmatpush3.msra.mxu0 %v1601_v28 }
  0x36   :  { %v303_v50 = vsub.f32 %v1613_v55, %v2030_v18  ;;  %v422_v11 = vsub.f32 %v1620_v43, %v2031_v39  ;;  %v2032_v51 = vand.u32 4294901760, %v1623_v36  ;;  %v2033_v32 = vand.u32 4294901760, %v1626_v27  ;;  %1064 = vmatprep.subr.mxu0 %v1603_v53 }
  0x37   :  { %v409_v23 = vand.u32 4294901760, %v408_v46  ;;  %v297_v18 = vand.u32 4294901760, %v296_v37  ;;  %v416_v55 = vand.u32 4294901760, %v415_v52  ;;  %v2034_v54 = vand.u32 4294901760, %v1633_v40  ;;  %1065 = vmatpush3.msra.mxu0 %v1615_v29 }
  0x38   :  { %v310_v42 = vsub.f32 %v1623_v36, %v2032_v51  ;;  %v429_v41 = vsub.f32 %v1626_v27, %v2033_v32  ;;  %v304_v59 = vand.u32 4294901760, %v303_v50  ;;  %v423_v39 = vand.u32 4294901760, %v422_v11  ;;  %1110 = vmatprep.subr.mxu0 %v1357_v14 }
  0x39   :  { %v317_v46 = vsub.f32 %v1633_v40, %v2034_v54  ;;  %1096 = vmatprep.subr.mxu1 %v409_v23  ;;  %v28_v37 = vlaneseq }
  0x3a   :  { %1097 = vmatpush3.msra.mxu1 %v297_v18  ;;  %v311_v51 = vand.u32 4294901760, %v310_v42  ;;  %v430_v36 = vand.u32 4294901760, %v429_v41 }
  0x3b   :  { %1098 = vmatprep.subr.mxu1 %v416_v55  ;;  %v318_v32 = vand.u32 4294901760, %v317_v46  ;;  %v1670_v54 = vand.u32 127, %v28_v37  ;;  %v1318_v55 = vmov 0.0  }
  0x3c   :  { %1099 = vmatpush3.msra.mxu1 %v304_v59  ;;  %v1994_v59 = vmov 1.0  }
  0x3d   :  { %1100 = vmatprep.subr.mxu1 %v423_v39  ;;  %2035 = vst [vmem:[#allocation29_spill] sm:$0xff] %v1670_v54  ;;  %v1673_v23 = vadd.s32 128, %v1670_v54 }
  0x3e   :  { %1101 = vmatpush3.msra.mxu1 %v311_v51 }
  0x3f   :  { %1102 = vmatprep.subr.mxu1 %v430_v36 }
  0x40   :  { %1103 = vmatpush3.msra.mxu1 %v318_v32 }
  0x41   :  { %1148 = vmatprep.subr.mxu1 %v1348_v4 }
  0x8b   :  { %v1675_v52 = vpop.permute.xlu0 %32 }
  0x8c   :  { %vm37_vm0 = vcmp.eq.s32.totalorder %v1675_v52, %v1670_v54  ;;  %vm38_vm1 = vcmp.eq.s32.totalorder %v1675_v52, %v1673_v23 }
  0x8d   :  { %v1018_v36 = vsel %vm37_vm0, 1.0, %v1318_v55  ;;  %v1019_v41 = vsel %vm38_vm1, 1.0, %v1318_v55  ;;  %1022 = vmatprep.mubr.msk.f32.mxu1 %vm38_vm1, %v1994_v59 }
  0x8e   :  { %v178_v50 = vsub.f32 %v1019_v41, %v1019_v41  ;;  %v1691_v11 = vsub.f32 %v1018_v36, %v1018_v36  ;;  %1023 = vmatmul.mubr.msk.f32.vlgmr.msra.gmra.mxu1 %vm37_vm0, %v1994_v59 }
  0x8f   :  { %1149 = vmatpush3.msra.mxu1 %v1350_v8  ;;  %v1698_v42 = vpop.permute.xlu0 %35 }
  0x90   :  { %2036 = vst [vmem:[#allocation30_spill] sm:$0xff] %v1698_v42  ;;  %1150 = vmatprep.subr.mxu1 %v1352_v9  ;;  %vm39_vm2 = vcmp.eq.s32.totalorder %v1698_v42, %v1670_v54  ;;  %vm40_vm3 = vcmp.eq.s32.totalorder %v1698_v42, %v1673_v23  ;;  %v179_v18 = vand.u32 4294901760, %v178_v50  ;;  %v1996_v46 = vand.u32 4294901760, %v1691_v11  ;;  %v2046_v42 = vld [vmem:[#allocation17_spill] sm:$0xff]  ;;  %v2047_v54 = vld [vmem:[#allocation18_spill] sm:$0xff] }
  0x91   :  { %v1020_v39 = vsel %vm39_vm2, 1.0, %v1318_v55  ;;  %v1021_v51 = vsel %vm40_vm3, 1.0, %v1318_v55  ;;  %1151 = vmatpush3.msra.mxu1 %v1354_v10  ;;  %1024 = vmatprep.mubr.msk.f32.mxu1 %vm40_vm3, %v1994_v59 }
  0x92   :  { %v1717_v32 = vsub.f32 %v1021_v51, %v1021_v51  ;;  %v1719_v37 = vsub.f32 %v1020_v39, %v1020_v39  ;;  %1152 = vmatprep.subr.mxu1 %v1359_v15  ;;  %1025 = vmatmul.mubr.msk.f32.gmra.mxu1 %vm39_vm2, %v1994_v59  ;;  %v180_v36 = vsub.f32 %v178_v50, %v179_v18 }
  0x93   :  { %1153 = vmatpush3.msra.mxu1 %v1361_v16  ;;  %693 = vmatprep.mubr.f32.mxu1 %v179_v18  ;;  %v186_v55 = vsub.f32 %v1691_v11, %v1996_v46 }
  0x94   :  { %1154 = vmatprep.subr.mxu1 %v1363_v17  ;;  %v181_v41 = vand.u32 4294901760, %v180_v36  ;;  %v194_v39 = vand.u32 4294901760, %v1717_v32  ;;  %v1997_v51 = vand.u32 4294901760, %v1719_v37 }
  0x95   :  { %1155 = vmatpush3.msra.mxu1 %v1375_v22  ;;  %v187_v14 = vand.u32 4294901760, %v186_v55  ;;  %v2041_v55 = vld [vmem:[#allocation13_spill] sm:$0xff] }
  0x96   :  { %1156 = vmatprep.subr.mxu1 %v1428_v57  ;;  %182 = vmatprep.mubr.f32.mxu0 %v181_v41  ;;  %v195_v59 = vsub.f32 %v1717_v32, %v194_v39  ;;  %v201_v18 = vsub.f32 %v1719_v37, %v1997_v51  ;;  %v2042_v41 = vld [vmem:[#allocation19_spill] sm:$0xff]  ;;  %v2045_v51 = vld [vmem:[#allocation16_spill] sm:$0xff] }
  0x97   :  { %1157 = vmatpush3.msra.mxu1 %v1430_v60  ;;  %188 = vmatmul.mubr.f32.vlgmr.msra.gmra.mxu0 %v187_v14  ;;  %v2037_v14 = vld [vmem:[#allocation9_spill] sm:$0xff] }
  0x98   :  { %1111 = vmatpush3.msra.mxu0 %v1367_v19  ;;  %1158 = vmatprep.subr.mxu1 %v1432_v61  ;;  %v196_v36 = vand.u32 4294901760, %v195_v59  ;;  %v202_v46 = vand.u32 4294901760, %v201_v18  ;;  %v2038_v59 = vld [vmem:[#allocation10_spill] sm:$0xff] }
  0x99   :  { %1112 = vmatprep.subr.mxu0 %v1370_v20  ;;  %1159 = vmatpush3.msra.mxu1 %v1434_v62  ;;  %v2043_v18 = vld [vmem:[#allocation14_spill] sm:$0xff] }
  0x9a   :  { %1113 = vmatpush3.msra.mxu0 %v1373_v21  ;;  %1160 = vmatprep.subr.mxu1 %v1439_v0 }
  0x9b   :  { %197 = vmatprep.mubr.f32.mxu0 %v196_v36  ;;  %1114 = vmatprep.subr.mxu0 %v1380_v24  ;;  %v2044_v36 = vld [vmem:[#allocation15_spill] sm:$0xff] }
  0x9c   :  { %1161 = vmatpush3.msra.mxu1 %v1441_v1  ;;  %203 = vmatmul.mubr.f32.gmra.mxu0 %v202_v46  ;;  %v2040_v46 = vld [vmem:[#allocation12_spill] sm:$0xff] }
  0x9d   :  { %1115 = vmatpush3.msra.mxu0 %v1383_v25  ;;  %1162 = vmatprep.subr.mxu1 %v1443_v2 }
  0x9e   :  { %1116 = vmatprep.subr.mxu0 %v1386_v26  ;;  %577 = vmatprep.mubr.f32.mxu0 %v178_v50  ;;  %v2039_v50 = vld [vmem:[#allocation11_spill] sm:$0xff] }
  0x9f   :  { %1163 = vmatpush3.msra.mxu1 %v1455_v7  ;;  %1117 = vmatpush3.msra.mxu0 %v1393_v30 }
  0xa0   :  { %1164 = vmatprep.subr.mxu1 %v1508_v31  ;;  %1118 = vmatprep.subr.mxu0 %v1437_v63 }
  0xa1   :  { %1165 = vmatpush3.msra.mxu1 %v1510_v44  ;;  %1119 = vmatpush3.msra.mxu0 %v1447_v3 }
  0xa2   :  { %1166 = vmatprep.subr.mxu1 %v1512_v45  ;;  %1120 = vmatprep.subr.mxu0 %v1450_v5 }
  0xa3   :  { %1167 = vmatpush3.msra.mxu1 %v1514_v38  ;;  %1121 = vmatpush3.msra.mxu0 %v1453_v6 }
  0xa4   :  { %1168 = vmatprep.subr.mxu1 %v1519_v34  ;;  %1122 = vmatprep.subr.mxu0 %v1460_v12 }
  0xa5   :  { %1169 = vmatpush3.msra.mxu1 %v1521_v48  ;;  %1123 = vmatpush3.msra.mxu0 %v1463_v13 }
  0xa6   :  { %1170 = vmatprep.subr.mxu1 %v1523_v49  ;;  %1124 = vmatprep.subr.mxu0 %v2037_v14 }
  0xa7   :  { %1171 = vmatpush3.msra.mxu1 %v1535_v47  ;;  %1125 = vmatpush3.msra.mxu0 %v2038_v59 }
  0xa8   :  { %1172 = vmatprep.subr.mxu1 %v1588_v58  ;;  %1126 = vmatprep.subr.mxu0 %v2039_v50 }
  0xa9   :  { %1173 = vmatpush3.msra.mxu1 %v1590_v35  ;;  %1127 = vmatpush3.msra.mxu0 %v2040_v46 }
  0xaa   :  { %1174 = vmatprep.subr.mxu1 %v1592_v56  ;;  %1128 = vmatprep.subr.mxu0 %v2041_v55 }
  0xab   :  { %1175 = vmatpush3.msra.mxu1 %v2042_v41  ;;  %1129 = vmatpush3.msra.mxu0 %v2043_v18  ;;  %v2048_v41 = vand.u32 4294901760, %v1691_v11 }
  0xac   :  { %1176 = vmatprep.subr.mxu1 %v1599_v33  ;;  %1130 = vmatprep.subr.mxu0 %v2044_v36  ;;  %v2049_v33 = vld [vmem:[#allocation20_spill] sm:$0xff] }
  0xad   :  { %1177 = vmatpush3.msra.mxu1 %v1601_v28  ;;  %1131 = vmatpush3.msra.mxu0 %v2045_v51  ;;  %v2050_v28 = vld [vmem:[#allocation24_spill] sm:$0xff] }
  0xae   :  { %1178 = vmatprep.subr.mxu1 %v1603_v53  ;;  %1132 = vmatprep.subr.mxu0 %v2046_v42  ;;  %v2051_v53 = vld [vmem:[#allocation25_spill] sm:$0xff] }
  0xaf   :  { %1179 = vmatpush3.msra.mxu1 %v1615_v29  ;;  %1133 = vmatpush3.msra.mxu0 %v2047_v54  ;;  %v2052_v29 = vld [vmem:[#allocation26_spill] sm:$0xff]  ;;  %v2053_v54 = vand.u32 4294901760, %v1719_v37 }
  0xb0   :  { %697 = vmatmul.mubr.f32.vlgmr.msra.gmra.mxu1 %v2048_v41  ;;  %1224 = vmatprep.subr.mxu1 %v1348_v4  ;;  %v2054_v4 = vmov 1.0  }
  0xb1   :  { %1134 = vmatprep.subr.mxu0 %v2049_v33  ;;  %704 = vmatprep.mubr.f32.mxu1 %v194_v39 }
  0xb2   :  { %1225 = vmatpush3.msra.mxu1 %v1350_v8  ;;  %1135 = vmatpush3.msra.mxu0 %v2050_v28  ;;  %v2055_v8 = vld [vmem:[#allocation28_spill] sm:$0xff] }
  0xb3   :  { %1226 = vmatprep.subr.mxu1 %v1352_v9  ;;  %1136 = vmatprep.subr.mxu0 %v2051_v53  ;;  %v2056_v9 = vld [vmem:[#allocation8_spill] sm:$0xff] }
  0xb4   :  { %1227 = vmatpush3.msra.mxu1 %v1354_v10  ;;  %1137 = vmatpush3.msra.mxu0 %v2052_v29  ;;  %v2057_v10 = vand.u32 4294901760, %v2056_v9 }
  0xb5   :  { %708 = vmatmul.mubr.f32.gmra.mxu1 %v2053_v54  ;;  %1228 = vmatprep.subr.mxu1 %v1359_v15  ;;  %v2058_v15 = vand.u32 4294901760, %v1367_v19  ;;  %v2062_v19 = vand.u32 4294901760, %v1383_v25  ;;  %v2066_v25 = vand.u32 4294901760, %v1447_v3  ;;  %v2079_v3 = vand.u32 4294901760, %v2044_v36 }
  0xb6   :  { %1138 = vmatprep.subr.mxu0 %v1620_v43  ;;  %1229 = vmatpush3.msra.mxu1 %v1361_v16  ;;  %v2059_v16 = vand.u32 4294901760, %v1370_v20  ;;  %v2063_v20 = vand.u32 4294901760, %v1386_v26  ;;  %v2067_v26 = vand.u32 4294901760, %v1450_v5  ;;  %v2080_v5 = vld [vmem:[#allocation22_spill] sm:$0xff] }
  0xb7   :  { %1030 = vmatprep.mubr.msk.f32.mxu1 %vm38_vm1, %v2054_v4  ;;  %1139 = vmatpush3.msra.mxu0 %v2055_v8 }
  0xb8   :  { %1230 = vmatprep.subr.mxu1 %v1363_v17  ;;  %1140 = vmatprep.subr.mxu0 %v1626_v27  ;;  %v2060_v17 = vand.u32 4294901760, %v1373_v21  ;;  %v2064_v21 = vand.u32 4294901760, %v1393_v30  ;;  %v2068_v30 = vand.u32 4294901760, %v1453_v6  ;;  %v2081_v6 = vand.u32 4294901760, %v2045_v51 }
  0xb9   :  { %1231 = vmatpush3.msra.mxu1 %v1375_v22  ;;  %1141 = vmatpush3.msra.mxu0 %v1633_v40  ;;  %v2061_v22 = vand.u32 4294901760, %v1380_v24  ;;  %v2065_v24 = vand.u32 4294901760, %v1437_v63  ;;  %v2075_v63 = vand.u32 4294901760, %v2041_v55 }
  0xba   :  { %1232 = vmatprep.subr.mxu1 %v1428_v57  ;;  %580 = vmatmul.mubr.f32.vlgmr.msra.gmra.mxu0 %v1691_v11  ;;  %v2069_v57 = vand.u32 4294901760, %v1460_v12  ;;  %v2083_v12 = vand.u32 4294901760, %v2046_v42 }
  0xbb   :  { %1186 = vmatprep.subr.mxu0 %v2057_v10  ;;  %1233 = vmatpush3.msra.mxu1 %v1430_v60  ;;  %v2070_v60 = vand.u32 4294901760, %v1463_v13  ;;  %v2084_v13 = vld [vmem:[#allocation27_spill] sm:$0xff] }
  0xbc   :  { %586 = vmatprep.mubr.f32.mxu0 %v1717_v32  ;;  %1187 = vmatpush3.msra.mxu0 %v2058_v15 }
  0xbd   :  { %1234 = vmatprep.subr.mxu1 %v1432_v61  ;;  %1188 = vmatprep.subr.mxu0 %v2059_v16  ;;  %v2071_v61 = vand.u32 4294901760, %v2037_v14 }
  0xbe   :  { %1235 = vmatpush3.msra.mxu1 %v1434_v62  ;;  %1189 = vmatpush3.msra.mxu0 %v2060_v17  ;;  %v2074_v62 = vand.u32 4294901760, %v2040_v46 }
  0xbf   :  { %1236 = vmatprep.subr.mxu1 %v1439_v0  ;;  %589 = vmatmul.mubr.f32.gmra.mxu0 %v1719_v37  ;;  %v2076_v0 = vld [vmem:[#allocation19_spill] sm:$0xff] }
  0xc0   :  { %1190 = vmatprep.subr.mxu0 %v2061_v22  ;;  %1237 = vmatpush3.msra.mxu1 %v1441_v1  ;;  %v2077_v1 = vand.u32 4294901760, %v2043_v18 }
  0xc1   :  { %1191 = vmatpush3.msra.mxu0 %v2062_v19  ;;  %1026 = vmatprep.mubr.msk.f32.mxu0 %vm38_vm1, %v2054_v4 }
  0xc2   :  { %1238 = vmatprep.subr.mxu1 %v1443_v2  ;;  %1192 = vmatprep.subr.mxu0 %v2063_v20  ;;  %v2078_v2 = vld [vmem:[#allocation21_spill] sm:$0xff] }
  0xc3   :  { %1239 = vmatpush3.msra.mxu1 %v1455_v7  ;;  %1193 = vmatpush3.msra.mxu0 %v2064_v21  ;;  %v2082_v7 = vld [vmem:[#allocation23_spill] sm:$0xff] }
  0xc4   :  { %1240 = vmatprep.subr.mxu1 %v1508_v31  ;;  %1194 = vmatprep.subr.mxu0 %v2065_v24  ;;  %v2085_v31 = vld [vmem:[#allocation18_spill] sm:$0xff] }
  0xc5   :  { %1241 = vmatpush3.msra.mxu1 %v1510_v44  ;;  %1195 = vmatpush3.msra.mxu0 %v2066_v25  ;;  %v2086_v44 = vand.u32 4294901760, %v2085_v31 }
  0xc6   :  { %1242 = vmatprep.subr.mxu1 %v1512_v45  ;;  %1196 = vmatprep.subr.mxu0 %v2067_v26 }
  0xc7   :  { %1243 = vmatpush3.msra.mxu1 %v1514_v38  ;;  %1197 = vmatpush3.msra.mxu0 %v2068_v30  ;;  %v2072_v38 = vand.u32 4294901760, %v2038_v59 }
  0xc8   :  { %1244 = vmatprep.subr.mxu1 %v1519_v34  ;;  %1198 = vmatprep.subr.mxu0 %v2069_v57  ;;  %v2073_v34 = vand.u32 4294901760, %v2039_v50 }
  0xc9   :  { %1245 = vmatpush3.msra.mxu1 %v1521_v48  ;;  %1199 = vmatpush3.msra.mxu0 %v2070_v60  ;;  %v2088_v48 = vand.u32 4294901760, %v2049_v33  ;;  %v2093_v33 = vand.u32 4294901760, %v1620_v43 }
  0xca   :  { %1246 = vmatprep.subr.mxu1 %v1523_v49  ;;  %1200 = vmatprep.subr.mxu0 %v2071_v61 }
  0xcb   :  { %1247 = vmatpush3.msra.mxu1 %v1535_v47  ;;  %1201 = vmatpush3.msra.mxu0 %v2072_v38  ;;  %v2090_v47 = vand.u32 4294901760, %v2050_v28  ;;  %v2095_v28 = vand.u32 4294901760, %v1626_v27 }
  0xcc   :  { %1248 = vmatprep.subr.mxu1 %v1588_v58  ;;  %1202 = vmatprep.subr.mxu0 %v2073_v34  ;;  %v2091_v58 = vand.u32 4294901760, %v2051_v53  ;;  %v2096_v53 = vand.u32 4294901760, %v1633_v40 }
  0xcd   :  { %1249 = vmatpush3.msra.mxu1 %v1590_v35  ;;  %1203 = vmatpush3.msra.mxu0 %v2074_v62  ;;  %v2092_v35 = vand.u32 4294901760, %v2052_v29 }
  0xce   :  { %1250 = vmatprep.subr.mxu1 %v1592_v56  ;;  %1204 = vmatprep.subr.mxu0 %v2075_v63  ;;  %v2094_v56 = vand.u32 4294901760, %v2055_v8 }
  0xcf   :  { %1251 = vmatpush3.msra.mxu1 %v2076_v0  ;;  %1205 = vmatpush3.msra.mxu0 %v2077_v1 }
  0xd0   :  { %1252 = vmatprep.subr.mxu1 %v2078_v2  ;;  %1206 = vmatprep.subr.mxu0 %v2079_v3 }
  0xd1   :  { %1253 = vmatpush3.msra.mxu1 %v2080_v5  ;;  %1207 = vmatpush3.msra.mxu0 %v2081_v6 }
  0xd2   :  { %1254 = vmatprep.subr.mxu1 %v2082_v7  ;;  %1208 = vmatprep.subr.mxu0 %v2083_v12 }
  0xd3   :  { %1255 = vmatpush3.msra.mxu1 %v2084_v13  ;;  %1209 = vmatpush3.msra.mxu0 %v2086_v44 }
  0xd4   :  { %1031 = vmatmul.mubr.msk.f32.vlgmr.msra.gmra.mxu1 %vm37_vm0, %v2054_v4  ;;  %1210 = vmatprep.subr.mxu0 %v2088_v48 }
  0xd5   :  { %1032 = vmatprep.mubr.msk.f32.mxu1 %vm40_vm3, %v2054_v4  ;;  %1211 = vmatpush3.msra.mxu0 %v2090_v47 }
  0xd6   :  { %1212 = vmatprep.subr.mxu0 %v2091_v58 }
  0xd7   :  { %1213 = vmatpush3.msra.mxu0 %v2092_v35 }
  0xd8   :  { %1033 = vmatmul.mubr.msk.f32.gmra.mxu1 %vm39_vm2, %v2054_v4  ;;  %1214 = vmatprep.subr.mxu0 %v2093_v33 }
  0xd9   :  { %1215 = vmatpush3.msra.mxu0 %v2094_v56 }
  0xda   :  { %1216 = vmatprep.subr.mxu0 %v2095_v28 }
  0xdb   :  { %1217 = vmatpush3.msra.mxu0 %v2096_v53 }
  0xdc   :  { %1027 = vmatmul.mubr.msk.f32.vlgmr.msra.gmra.mxu0 %vm37_vm0, %v2054_v4 }
  0xdd   :  { %1028 = vmatprep.mubr.msk.f32.mxu0 %vm40_vm3, %v2054_v4 }
  0xe0   :  { %1029 = vmatmul.mubr.msk.f32.gmra.mxu0 %vm39_vm2, %v2054_v4 }
 0x14e   :  { %v1104_v29 = vpop.f32.mrf.mxu1 }
 0x150   :  { %v1105_v43 = vpop.f32.mrf.mxu1 }
 0x151   :  { %v1106_v55 = vadd.f32 %v1105_v43, %v1104_v29 }
 0x152   :  { %v1107_v40 = vpop.f32.mrf.mxu1 }
 0x154   :  { %v1108_v11 = vpop.f32.mrf.mxu1 }
 0x155   :  { %v1109_v9 = vadd.f32 %v1108_v11, %v1107_v40 }
 0x157   :  { %v1066_v27 = vpop.f32.mrf.mxu0 }
 0x159   :  { %v1067_v54 = vpop.f32.mrf.mxu0 }
 0x15a   :  { %v1068_v50 = vadd.f32 %v1067_v54, %v1066_v27 }
 0x15c   :  { %v1069_v42 = vpop.f32.mrf.mxu0  ;;  %v437_v36 = vadd.f32 %v1106_v55, %v1068_v50 }
 0x15e   :  { %v1070_v52 = vpop.f32.mrf.mxu0 }
 0x15f   :  { %v1071_v4 = vadd.f32 %v1070_v52, %v1069_v42 }
 0x161   :  { %v444_v17 = vadd.f32 %v1109_v9, %v1071_v4 }
 0x170   :  { %v1180_v32 = vpop.f32.mrf.mxu1 }
 0x172   :  { %v1181_v37 = vpop.f32.mrf.mxu1 }
 0x173   :  { %v1182_v22 = vadd.f32 %v1181_v37, %v1180_v32 }
 0x175   :  { %v1183_v51 = vpop.f32.mrf.mxu1 }
 0x177   :  { %v1184_v23 = vpop.f32.mrf.mxu1 }
 0x178   :  { %v1185_v30 = vadd.f32 %v1184_v23, %v1183_v51 }
 0x17a   :  { %v1142_v39 = vpop.f32.mrf.mxu0 }
 0x17c   :  { %v1143_v14 = vpop.f32.mrf.mxu0 }
 0x17d   :  { %v1144_v41 = vadd.f32 %v1143_v14, %v1142_v39 }
 0x17f   :  { %v1145_v59 = vpop.f32.mrf.mxu0  ;;  %v582_v10 = vadd.f32 %v1144_v41, %v437_v36 }
 0x181   :  { %v1146_v18 = vpop.f32.mrf.mxu0  ;;  %v699_v24 = vadd.f32 %v1182_v22, %v582_v10 }
 0x182   :  { %v1147_v15 = vadd.f32 %v1146_v18, %v1145_v59 }
 0x184   :  { %v591_v21 = vadd.f32 %v1147_v15, %v444_v17 }
 0x186   :  { %v710_v62 = vadd.f32 %v1185_v30, %v591_v21 }
 0x194   :  { %v1256_v46 = vpop.f32.mrf.mxu1 }
 0x196   :  { %v1257_v8 = vpop.f32.mrf.mxu1 }
 0x197   :  { %v1258_v57 = vadd.f32 %v1257_v8, %v1256_v46 }
 0x198   :  { %v1259_v19 = vpop.f32.mrf.mxu1 }
 0x19a   :  { %v1260_v61 = vpop.f32.mrf.mxu1 }
 0x19b   :  { %v1261_v0 = vadd.f32 %v1260_v61, %v1259_v19 }
 0x19c   :  { %v1218_v16 = vpop.f32.mrf.mxu0 }
 0x19e   :  { %v1219_v20 = vpop.f32.mrf.mxu0 }
 0x19f   :  { %v1220_v25 = vadd.f32 %v1219_v20, %v1218_v16 }
 0x1a0   :  { %v1221_v26 = vpop.f32.mrf.mxu0 }
 0x1a1   :  { %v878_v60 = vadd.f32 %v1220_v25, %v699_v24 }
 0x1a2   :  { %v1222_v38 = vpop.f32.mrf.mxu0 }
 0x1a3   :  { %v989_v34 = vadd.f32 %v1258_v57, %v878_v60  ;;  %v1223_v63 = vadd.f32 %v1222_v38, %v1221_v26 }
 0x1a5   :  { %999 = vst [vmem:[#allocation5] sm:$0xff] %v989_v34  ;;  %v885_v1 = vadd.f32 %v1223_v63, %v710_v62 }
 0x1a7   :  { %v996_v2 = vadd.f32 %v1261_v0, %v885_v1 }
 0x1a9   :  { %1000 = vst [vmem:[#allocation5 + $0x8] sm:$0xff] %v996_v2 }
 0x1aa   :  { %1301 = shalt.err (!%p1298_p9)
}
 0x1ab   :  { %1012 = dma.vmem_to_hbm [thread:$0]  %s1007_s1, 256, %s1936_s2, [#allocation4], %s1315_s12, %s1315_s12, %s1316_s13  }
 0x1ac   :  { %1312 = dma.done.wait [#allocation4], 256  }
 0x1ad   :  { %1313 = vsyncadd [#allocation4], 4294967040 }
 0x1ae   :  { %1016 = vsyncpa [#allocation3], 1 }
 0x1af   :  { %1017 = vsyncpa [#allocation4], 1 }

</bundles_post_ra>
